<compile_context>
chip_gen: v7x
topology: tpu7x:2x2x1
jax: 0.10.0
libtpu: 0.0.40
codegen_flags: <defaults>
</compile_context>

<pallas_src>
import math

import jax
import jax.numpy as jnp
from jax import lax
from jax.experimental import pallas as pl
from jax.experimental.pallas import tpu as pltpu


def _round_up(x, m):
    return ((x + m - 1) // m) * m


def _vmem_limit_bytes():
    """Generation-aware scoped-VMEM limit (~48 MiB on v7x, ~96-100 MiB on v5e/v6e)."""
    cap = 64 * 1024 * 1024
    try:
        info = pltpu.get_tpu_info()
        cap = int(getattr(info, "vmem_capacity_bytes", cap))
    except Exception:
        pass
    return min(int(cap * 0.75), 100 * 1024 * 1024)


# ----------------------------------------------------------------------------
# 1) Word-embedding lookup: manual DMA gather (table stays in HBM).
# ----------------------------------------------------------------------------
def _make_embed_gather_kernel(num_valid):
    """Gather rows straight into the output block; skip padded tail slots."""

    def kernel(ids_ref, table_ref, out_ref, sem):
        tpb = out_ref.shape[0]
        base = pl.program_id(0) * tpb

        @pl.loop(0, tpb)
        def _start(t):
            @pl.when(base + t < num_valid)
            def _():
                pltpu.make_async_copy(
                    table_ref.at[ids_ref[base + t]], out_ref.at[t], sem.at[t]
                ).start()

        @pl.loop(0, tpb)
        def _wait(t):
            @pl.when(base + t < num_valid)
            def _():
                pltpu.make_async_copy(
                    table_ref.at[0], out_ref.at[t], sem.at[t]
                ).wait()

    return kernel


def embedding_lookup(input_ids, table, *, tokens_per_block=128):
    """word_embeddings(input_ids): table[input_ids] via per-row async DMAs."""
    V, D = table.shape
    lead = input_ids.shape
    M = int(math.prod(lead)) if lead else 1
    ids = input_ids.reshape(M).astype(jnp.int32)

    T = min(tokens_per_block, _round_up(M, 8))
    M_pad = _round_up(M, T)
    if M_pad != M:
        ids = jnp.pad(ids, (0, M_pad - M))  # padded slots issue no DMA (guarded)

    out = pl.pallas_call(
        _make_embed_gather_kernel(M),
        out_shape=jax.ShapeDtypeStruct((M_pad, D), table.dtype),
        grid_spec=pltpu.PrefetchScalarGridSpec(
            num_scalar_prefetch=1,                        # ids -> SMEM
            grid=(M_pad // T,),
            in_specs=[pl.BlockSpec(memory_space=pl.ANY)],  # table stays in HBM
            out_specs=pl.BlockSpec((T, D), lambda i, ids_ref: (i, 0)),
            scratch_shapes=[pltpu.SemaphoreType.DMA((T,))],
        ),
        compiler_params=pltpu.CompilerParams(dimension_semantics=("arbitrary",)),
    )(ids, table)

    if M_pad != M:
        out = out[:M]
    return out.reshape(*lead, D)


# ----------------------------------------------------------------------------
# 2) Tied output projection: Y = X @ W.T, W in native (vocab, hidden) layout.
# ----------------------------------------------------------------------------
def _tied_linear_kernel(x_ref, w_ref, o_ref):
    # x_ref: (tm, K); w_ref: (tn, K) -- weight kept in PyTorch (out, in) layout.
    # Contract K of both operands directly; the MXU handles the transposed
    # operand for free, so no wrapper weight.T / HBM transpose is needed.
    o_ref[...] = lax.dot_general(
        x_ref[...],
        w_ref[...],
        dimension_numbers=(((1,), (1,)), ((), ())),
        preferred_element_type=jnp.float32,
    ).astype(o_ref.dtype)


def tied_linear(x, weight, *, tn=512, tm_cap=2048,
                compute_dtype=jnp.bfloat16, out_dtype=None):
    """F.linear(x, weight) with no bias.  weight: (N, K), x: [..., K].

    compute_dtype (default bf16) casts both operands once in the wrapper for
    the fast MXU path; accumulation stays f32 inside the kernel.  The vocab
    axis is padded to a lane-aligned multiple of tn so real vocab sizes never
    collapse the tile or fall back to a VMEM-busting full-N weight block.
    """
    *lead, K = x.shape
    N, K_w = weight.shape
    assert K == K_w, (K, K_w)

    M = int(math.prod(lead)) if lead else 1
    out_dtype = out_dtype if out_dtype is not None else x.dtype
    x2d = x.reshape(M, K)
    if compute_dtype is not None:
        x2d = x2d.astype(compute_dtype)
        weight = weight.astype(compute_dtype)

    in_bytes = jnp.dtype(x2d.dtype).itemsize
    out_bytes = jnp.dtype(out_dtype).itemsize
    sublane = 16 if in_bytes <= 2 else 8

    # --- N (vocab) tiling: pad once in the wrapper, never a full-N block. ---
    tn_eff = tn if N >= tn else _round_up(N, 128)
    N_pad = _round_up(N, tn_eff)
    if N_pad != N:
        weight = jnp.pad(weight, ((0, N_pad - N), (0, 0)))

    # --- M tiling: grow tm within a generation-aware VMEM budget so the huge
    # weight is streamed from HBM as few times as possible (ideally once). ---
    vmem_limit = _vmem_limit_bytes()
    budget = int(vmem_limit * 0.7)

    def _usage(t):  # double-buffered X + W blocks + output block
        return 2 * t * K * in_bytes + 2 * tn_eff * K * in_bytes + 2 * t * tn_eff * out_bytes

    tm = min(_round_up(M, sublane), tm_cap)
    while tm > sublane and _usage(tm) > budget:
        tm = max(sublane, _round_up(tm // 2, sublane))

    M_pad = _round_up(M, tm)
    if M_pad != M:
        x2d = jnp.pad(x2d, ((0, M_pad - M), (0, 0)))

    grid = (M_pad // tm, N_pad // tn_eff)

    out = pl.pallas_call(
        _tied_linear_kernel,
        out_shape=jax.ShapeDtypeStruct((M_pad, N_pad), out_dtype),
        grid_spec=pltpu.PrefetchScalarGridSpec(
            num_scalar_prefetch=0,
            grid=grid,
            in_specs=[
                # X: full-K block whose index ignores j -> DMA'd once per row
                # tile and kept resident across all output-column tiles.
                pl.BlockSpec((tm, K), lambda i, j: (i, 0)),
                # W: native (N, K) layout, lane-dense K stream.
                pl.BlockSpec((tn_eff, K), lambda i, j: (j, 0)),
            ],
            out_specs=pl.BlockSpec((tm, tn_eff), lambda i, j: (i, j)),
        ),
        compiler_params=pltpu.CompilerParams(
            dimension_semantics=("parallel", "parallel"),
            vmem_limit_bytes=vmem_limit,
        ),
        cost_estimate=pl.CostEstimate(
            flops=2 * M_pad * N_pad * K,
            transcendentals=0,
            # X read once; W re-streamed once per M tile; logits written once.
            bytes_accessed=(M_pad * K * in_bytes
                            + (M_pad // tm) * N_pad * K * in_bytes
                            + M_pad * N_pad * out_bytes),
        ),
    )(x2d, weight)

    if M_pad != M or N_pad != N:
        out = out[:M, :N]
    return out.reshape(*lead, N)


# ----------------------------------------------------------------------------
# GPT2Model.forward
# ----------------------------------------------------------------------------
def init_word_embeddings(key, vocab_size, hidden_size, dtype=jnp.float32):
    # init_method_normal(std=0.02) from the spec.
    return 0.02 * jax.random.normal(key, (vocab_size, hidden_size), dtype=dtype)


def gpt2_model_forward(word_embedding_weight, input_ids, position_ids=None,
                       attention_mask=None, *, compute_dtype=jnp.bfloat16):
    """Forward of GPT2Model with parallel_output=True (world_size == 1)."""
    words_embeddings = embedding_lookup(input_ids, word_embedding_weight)

    # TODO(synk): mpu.GPT2ParallelTransformer (sparse-attention layer stack) is an
    # external, MagicMock'd dependency in the spec, so its body is undefined there;
    # it is treated as identity here (position_ids / attention_mask are unused).
    transformer_output = words_embeddings

    # copy_to_model_parallel_region is the identity at world_size == 1.
    logits_parallel = tied_linear(
        transformer_output, word_embedding_weight, compute_dtype=compute_dtype
    )
    # parallel_output=True -> return the parallel logits directly.
    return logits_parallel


if __name__ == "__main__":
    key = jax.random.PRNGKey(0)
    k_emb, k_ids = jax.random.split(key)

    batch, seq, hidden, vocab = 2, 8, 256, 512

    word_emb = init_word_embeddings(k_emb, vocab, hidden)
    input_ids = jax.random.randint(k_ids, (batch, seq), 0, vocab, dtype=jnp.int32)
    position_ids = jnp.broadcast_to(jnp.arange(seq, dtype=jnp.int32), (batch, seq))
    attention_mask = jnp.ones((batch, 1, seq, seq), dtype=jnp.float32)

    # Default (bf16-compute) path.
    logits = gpt2_model_forward(word_emb, input_ids, position_ids, attention_mask)
    logits = jax.block_until_ready(logits)

    # References (torch forward with the mocked transformer treated as identity).
    emb_ref = word_emb[input_ids]
    logits_ref_f32 = emb_ref @ word_emb.T
    logits_ref_bf16 = jnp.einsum(
        "bsh,vh->bsv",
        emb_ref.astype(jnp.bfloat16),
        word_emb.astype(jnp.bfloat16),
        preferred_element_type=jnp.float32,
    )
    assert logits.shape == (batch, seq, vocab)
    assert jnp.allclose(logits, logits_ref_bf16, atol=2e-3, rtol=2e-2)
    assert jnp.allclose(logits, logits_ref_f32, atol=5e-2, rtol=5e-2)

    # Exercise the embedding-gather kernel directly (pure copy -> exact).
    emb = jax.block_until_ready(embedding_lookup(input_ids, word_emb))
    assert jnp.array_equal(emb, emb_ref)

    # Exercise the f32-compute matmul path (tighter tolerance).
    logits_f32 = jax.block_until_ready(
        tied_linear(emb_ref, word_emb, compute_dtype=jnp.float32)
    )
    assert jnp.allclose(logits_f32, logits_ref_f32, atol=5e-3, rtol=5e-3)

    # Exercise a non-lane-aligned vocab (wrapper pads N, slices it back).
    logits_odd = jax.block_until_ready(tied_linear(emb_ref, word_emb[:500]))
    assert logits_odd.shape == (batch, seq, 500)
    assert jnp.allclose(logits_odd, logits_ref_bf16[..., :500], atol=2e-3, rtol=2e-2)

    print("KERNEL_OK")
</pallas_src>

<mosaic_0001>
module attributes {stable_mosaic.version = 11 : i64} {
  func.func @kernel(%arg0: i32, %arg1: memref<16xi32, #tpu.memory_space<smem>>, %arg2: memref<512x256xf32, #tpu.memory_space<any>>, %arg3: memref<16x256xf32, #tpu.memory_space<vmem>>, %arg4: memref<16x!tpu.dma_semaphore, #tpu.memory_space<semaphore_mem>>) attributes {dimension_semantics = [#tpu.dimension_semantics<arbitrary>], iteration_bounds = array<i64: 1>, scalar_prefetch = 1 : i64, scratch_operands = 1 : i64, tpu.core_type = #tpu.core_type<tc>, window_params = [{}, {transform_indices = @transform_1, window_bounds = array<i64: 16, 256>}]} {
    %c16_i32 = arith.constant 16 : i32
    %0 = arith.muli %arg0, %c16_i32 : i32
    %c0_i32 = arith.constant 0 : i32
    %c16_i32_0 = arith.constant 16 : i32
    %1 = arith.addi %c0_i32, %c16_i32_0 : i32
    %c1_i32 = arith.constant 1 : i32
    scf.for %arg5 = %c0_i32 to %1 step %c1_i32  : i32 {
      %c1_i32_6 = arith.constant 1 : i32
      %3 = arith.muli %arg5, %c1_i32_6 : i32
      %c0_i32_7 = arith.constant 0 : i32
      %4 = arith.addi %c0_i32_7, %3 : i32
      %5 = arith.addi %0, %4 : i32
      %c16_i32_8 = arith.constant 16 : i32
      %6 = arith.cmpi slt, %5, %c16_i32_8 : i32
      %7 = arith.extui %6 : i1 to i32
      %c0_i32_9 = arith.constant 0 : i32
      %8 = arith.cmpi ne, %7, %c0_i32_9 : i32
      scf.if %8 {
        %9 = arith.addi %0, %4 : i32
        %10 = arith.index_cast %9 : i32 to index
        %11 = memref.load %arg1[%10] : memref<16xi32, #tpu.memory_space<smem>>
        %c0_i32_10 = arith.constant 0 : i32
        %12 = tpu.memref_slice %arg2[%11, %c0_i32_10] : memref<512x256xf32, #tpu.memory_space<any>> -> memref<1x256xf32, #tpu.memory_space<any>>
        %13 = tpu.memref_squeeze %12 : memref<1x256xf32, #tpu.memory_space<any>> -> memref<256xf32, #tpu.memory_space<any>>
        %c0_i32_11 = arith.constant 0 : i32
        %14 = tpu.memref_slice %arg3[%4, %c0_i32_11] : memref<16x256xf32, #tpu.memory_space<vmem>> -> memref<1x256xf32, #tpu.memory_space<vmem>>
        %15 = tpu.memref_squeeze %14 : memref<1x256xf32, #tpu.memory_space<vmem>> -> memref<256xf32, #tpu.memory_space<vmem>>
        %16 = tpu.memref_slice %arg4[%4] : memref<16x!tpu.dma_semaphore, #tpu.memory_space<semaphore_mem>> -> memref<1x!tpu.dma_semaphore, #tpu.memory_space<semaphore_mem>>
        %17 = tpu.memref_squeeze %16 : memref<1x!tpu.dma_semaphore, #tpu.memory_space<semaphore_mem>> -> memref<!tpu.dma_semaphore, #tpu.memory_space<semaphore_mem>>
        tpu.enqueue_dma source(%13 : memref<256xf32, #tpu.memory_space<any>>) target(%15 : memref<256xf32, #tpu.memory_space<vmem>>) target_semaphore(%17 : memref<!tpu.dma_semaphore, #tpu.memory_space<semaphore_mem>>)
      } else {
      }
    }
    %c16_i32_1 = arith.constant 16 : i32
    %c0_i32_2 = arith.constant 0 : i32
    %c16_i32_3 = arith.constant 16 : i32
    %2 = arith.addi %c0_i32_2, %c16_i32_3 : i32
    %c1_i32_4 = arith.constant 1 : i32
    scf.for %arg5 = %c0_i32_2 to %2 step %c1_i32_4  : i32 {
      %c1_i32_6 = arith.constant 1 : i32
      %3 = arith.muli %arg5, %c1_i32_6 : i32
      %c0_i32_7 = arith.constant 0 : i32
      %4 = arith.addi %c0_i32_7, %3 : i32
      %5 = arith.addi %0, %4 : i32
      %c16_i32_8 = arith.constant 16 : i32
      %6 = arith.cmpi slt, %5, %c16_i32_8 : i32
      %7 = arith.extui %6 : i1 to i32
      %c0_i32_9 = arith.constant 0 : i32
      %8 = arith.cmpi ne, %7, %c0_i32_9 : i32
      scf.if %8 {
        %c0_i32_10 = arith.constant 0 : i32
        %c0_i32_11 = arith.constant 0 : i32
        %9 = tpu.memref_slice %arg2[%c0_i32_10, %c0_i32_11] : memref<512x256xf32, #tpu.memory_space<any>> -> memref<1x256xf32, #tpu.memory_space<any>>
        %10 = tpu.memref_squeeze %9 : memref<1x256xf32, #tpu.memory_space<any>> -> memref<256xf32, #tpu.memory_space<any>>
        %c0_i32_12 = arith.constant 0 : i32
        %11 = tpu.memref_slice %arg3[%4, %c0_i32_12] : memref<16x256xf32, #tpu.memory_space<vmem>> -> memref<1x256xf32, #tpu.memory_space<vmem>>
        %12 = tpu.memref_squeeze %11 : memref<1x256xf32, #tpu.memory_space<vmem>> -> memref<256xf32, #tpu.memory_space<vmem>>
        %13 = tpu.memref_slice %arg4[%4] : memref<16x!tpu.dma_semaphore, #tpu.memory_space<semaphore_mem>> -> memref<1x!tpu.dma_semaphore, #tpu.memory_space<semaphore_mem>>
        %14 = tpu.memref_squeeze %13 : memref<1x!tpu.dma_semaphore, #tpu.memory_space<semaphore_mem>> -> memref<!tpu.dma_semaphore, #tpu.memory_space<semaphore_mem>>
        tpu.wait_dma2 semaphore(%14 : memref<!tpu.dma_semaphore, #tpu.memory_space<semaphore_mem>>) src(%10 : memref<256xf32, #tpu.memory_space<any>>) dst(%12 : memref<256xf32, #tpu.memory_space<vmem>>)
      } else {
      }
    }
    %c16_i32_5 = arith.constant 16 : i32
    return
  }
  func.func @transform_1(%arg0: i32, %arg1: memref<16xi32, #tpu.memory_space<smem>>) -> (i32, i32) {
    %c0_i32 = arith.constant 0 : i32
    %c0_i32_0 = arith.constant 0 : i32
    return %arg0, %c0_i32 : i32, i32
  }
}

</mosaic_0001>

<bundles_post_ra>
// kernel: tpu_custom_call.1
= control target key start
LH: loop header
LB: loop body
LE: loop exit
PB: predicated region body
PF: predicated region fallthrough
CT: control target
= control target key end

     0   :  { %s437_s0 = inlined_call_operand.hbm [shape: s32[16], index: 0, kind: input, shape index: {}]   ;;  %s438_s1 = inlined_call_operand.hbm [shape: f32[512,256], index: 1, kind: input, shape index: {}]   ;;  %s439_s2 = inlined_call_operand.hbm [shape: f32[16,256], index: 2, kind: output, shape index: {}]  }
   0x1   :  { %s253_s11 = scalar_lea.hbm %s437_s0, 16 }
   0x2   :  { %p254_p0 = scmp.ne.s32.totalorder %s437_s0, %s253_s11  ;;  %p257_p1 = scmp.lt.u32.totalorder %s253_s11, %s437_s0 }
   0x4   :  { %p259_p2 = pnand %p257_p1, %p254_p0 }
   0x6   :  { %262 = shalt.err (!%p259_p2)  }
   0x7   :  { %s337_s16 = smov [#allocation4]  }
   0x8   :  { %8 = dma.hbm_to_smem %s437_s0, 16, %s337_s16, [#allocation3] }
   0x9   :  { %321 = dma.done.wait [#allocation3], 16 }
   0xa   :  { %322 = vsyncadd [#allocation3], 4294967280 }
   0xb   :  { %10 = sfence }
   0xc   :  { %11 = vsyncpa [#allocation6], 0  ;;  %s370_s19 = smov 0  }
   0xd LB: > { %p229_p3 = scmp.lt.s32.totalorder %s331_s19, 16  ;;  %s31_s20 = sshrl.u32 %s331_s19, 3  ;;  %s331_s19 = sphi %s370_s19, %s18_s19  }
   0xe   : > { %s32_s0 = sand.u32 7, %s331_s19   ;;  %s205_s23 = sshll.u32 %s31_s20, 4 }
   0xf   : > { %s224_s21 = scalar_select %p229_p3, [#allocation4], [#allocation8] }
  0x10   : > { %s225_s22 = scalar_select %p229_p3, %s331_s19, 0 }
  0x11   : > { %s34_s25 = sadd.s32 %s205_s23, %s32_s0  ;;  %s36_s8 = scalar_lea.sflag [#allocation2], %s331_s19 }
  0x12   : > { %s24_s24 = sld [smem:[%s224_s21 + %s225_s22]]  ;;  %s35_s26 = scalar_lea.vmem [#allocation5], %s34_s25 }
  0x13   : > { %s38_s27 = sshll.u32 %s35_s26, 4  ;;  %s267_s12 = scalar_lea.hbm %s438_s1, 16384  ;;  %s383_s27 = int_to_ptr.vmem [resolvable:$true] %s38_s27 }
  0x18   : > { %s25_s28 = sshrl.u32 %s24_s24, 3  ;;  %s26_s29 = sand.u32 7, %s24_s24  }
  0x19   : > { %s203_s30 = sshll.u32 %s25_s28, 4 }
  0x1a   : > { %s28_s3 = sadd.s32 %s203_s30, %s26_s29 }
  0x1b   : > { %s204_s4 = sshll.u32 %s28_s3, 4 }
  0x1c   : > { %s388_s7 = scalar_lea.hbm %s438_s1, %s204_s4 }
  0x1d   : > { %s263_s9 = scalar_lea.hbm %s388_s7, 32  ;;  %p268_p7 = scmp.lt.u32.totalorder %s388_s7, %s438_s1 }
  0x1e   : > { %p264_p4 = scmp.ne.s32.totalorder %s388_s7, %s263_s9  ;;  %p269_p8 = scmp.lt.u32.totalorder %s267_s12, %s263_s9 }
  0x1f   : > { %p271_p10 = scmp.lt.u32.totalorder %s263_s9, %s388_s7 }
  0x20   : > { %p265_p5 = pnand %p264_p4, %p229_p3  ;;  %p270_p9 = por %p269_p8, %p268_p7 }
  0x22   : > { %p266_p6 = pneg %p265_p5  ;;  %p272_p11 = por %p271_p10, %p270_p9 }
  0x24   : > { %p273_p12 = pnand %p272_p11, %p266_p6 }
  0x26   : > { %276 = shalt.err (!%p273_p12)  }
  0x27   : > { %s277_s15 = scalar_lea.vmem %s383_s27, 32  ;;  %s338_s16 = smov [#allocation5]  }
  0x28   : > { %p278_p13 = scmp.ne.s32.totalorder %s383_s27, %s277_s15  ;;  %s281_s17 = sshll.u32 %s338_s16, 4  ;;  %s407_s17 = int_to_ptr.vmem [resolvable:$false] %s281_s17 }
  0x29   : > { %s283_s18 = scalar_lea.vmem %s407_s17, 512  ;;  %p284_p2 = scmp.lt.s32.totalorder %s383_s27, %s407_s17 }
  0x2a   : > { %p279_p0 = pnand %p278_p13, %p229_p3  ;;  %p285_p4 = scmp.lt.s32.totalorder %s283_s18, %s277_s15 }
  0x2c   : > { %p280_p1 = pneg %p279_p0  ;;  %p286_p5 = por %p285_p4, %p284_p2 }
  0x2e   : > { %p287_p6 = pnand %p286_p5, %p280_p1 }
  0x30   : > { %290 = shalt.err (!%p287_p6)  }
  0x31   : > { %s339_s20 = smov 128   ;;  %s340_s0 = smov 1  }
  0x32   : > { %226 = dma.hbm_to_vmem [thread:$0]  (%p229_p3), %s388_s7, 32, %s383_s27, %s36_s8, %s339_s20, %s339_s20, %s340_s0 }
  0x33   : > { %s18_s19 = sadd.s32 1, %s331_s19  }
  0x34   : > { %p15_p7 = scmp.ge.s32.totalorder %s18_s19, 16  }
  0x35   :  { %s333_s21 = smov (%p15_p7), 0  }
  0x36   :  { %17 = sbr.rel (!%p15_p7) target bundleno = 13 (0xd), region = 61 }
  0x3d LB: > { %p230_p8 = scmp.lt.s32.totalorder %s335_s21, 16  ;;  %s53_s22 = scalar_lea.sflag [#allocation2], %s335_s21  ;;  %s335_s21 = sphi %s333_s21, %s47_s21  }
  0x3f   : > { %324 = dma.done.wait (%p230_p8), %s53_s22, 32 }
  0x40   : > { %326 = vsyncadd (%p230_p8), %s53_s22, 4294967264  ;;  %s47_s21 = sadd.s32 1, %s335_s21  }
  0x41   : > { %p44_p9 = scmp.ge.s32.totalorder %s47_s21, 16  }
  0x42   :  { %p292_p3 = scmp.ne.s32.totalorder (%p44_p9), %s407_s17, %s283_s18  ;;  %p296_p10 = scmp.lt.s32.totalorder (%p44_p9), %s407_s17, %s407_s17 }
  0x43   :  { %46 = sbr.rel (!%p44_p9) target bundleno = 61 (0x3d), region = 72  ;;  %p297_p11 = scmp.lt.s32.totalorder (%p44_p9), %s283_s18, %s283_s18 }
  0x45   :  { %p298_p12 = por (%p44_p9), %p297_p11, %p296_p10 }
  0x47   :  { %p299_p13 = pnand (%p44_p9), %p298_p12, %p292_p3 }
  0x4a   :  { %302 = shalt.err (!%p299_p13)
}
  0x4b   :  { %s303_s23 = scalar_lea.hbm %s439_s2, 512 }
  0x4c   :  { %p304_p0 = scmp.ne.s32.totalorder %s439_s2, %s303_s23  ;;  %p307_p1 = scmp.lt.u32.totalorder %s303_s23, %s439_s2 }
  0x4e   :  { %p309_p2 = pnand %p307_p1, %p304_p0 }
  0x50   :  { %312 = shalt.err (!%p309_p2)
}
  0x51   :  { %s341_s28 = smov 256   ;;  %s342_s29 = smov 16  }
  0x52   :  { %67 = dma.vmem_to_hbm [thread:$0]  %s407_s17, 512, %s439_s2, [#allocation6], %s341_s28, %s341_s28, %s342_s29  }
  0x53   :  { %327 = dma.done.wait [#allocation6], 512  }
  0x54   :  { %328 = vsyncadd [#allocation6], 4294966784 }
  0x55   :  { %71 = vsyncpa [#allocation6], 1 }
  0x56   :  { %72 = vsyncmov [#allocation2] }
  0x59   :  { %s73_s4 = vpop.sfrf %72 }
  0x5a   :  { %p207_p4 = scmp.ne.s32.totalorder %s73_s4, 0 }
  0x5c   :  { %77 = shalt.err (%p207_p4)  }
  0x5d   :  { %79 = vsyncmov [#allocation2 + $0x1] }
  0x60   :  { %s80_s5 = vpop.sfrf %79 }
  0x61   :  { %p208_p5 = scmp.ne.s32.totalorder %s80_s5, 0 }
  0x63   :  { %84 = shalt.err (%p208_p5)  }
  0x64   :  { %86 = vsyncmov [#allocation2 + $0x2] }
  0x67   :  { %s87_s6 = vpop.sfrf %86 }
  0x68   :  { %p209_p6 = scmp.ne.s32.totalorder %s87_s6, 0 }
  0x6a   :  { %91 = shalt.err (%p209_p6)  }
  0x6b   :  { %93 = vsyncmov [#allocation2 + $0x3] }
  0x6e   :  { %s94_s7 = vpop.sfrf %93 }
  0x6f   :  { %p210_p7 = scmp.ne.s32.totalorder %s94_s7, 0 }
  0x71   :  { %98 = shalt.err (%p210_p7)  }
  0x72   :  { %100 = vsyncmov [#allocation2 + $0x4] }
  0x75   :  { %s101_s2 = vpop.sfrf %100 }
  0x76   :  { %p211_p8 = scmp.ne.s32.totalorder %s101_s2, 0 }
  0x78   :  { %105 = shalt.err (%p211_p8)  }
  0x79   :  { %107 = vsyncmov [#allocation2 + $0x5] }
  0x7c   :  { %s108_s8 = vpop.sfrf %107 }
  0x7d   :  { %p212_p9 = scmp.ne.s32.totalorder %s108_s8, 0 }
  0x7f   :  { %112 = shalt.err (%p212_p9)  }
  0x80   :  { %114 = vsyncmov [#allocation2 + $0x6] }
  0x83   :  { %s115_s9 = vpop.sfrf %114 }
  0x84   :  { %p213_p3 = scmp.ne.s32.totalorder %s115_s9, 0 }
  0x86   :  { %119 = shalt.err (%p213_p3)  }
  0x87   :  { %121 = vsyncmov [#allocation2 + $0x7] }
  0x8a   :  { %s122_s10 = vpop.sfrf %121 }
  0x8b   :  { %p214_p10 = scmp.ne.s32.totalorder %s122_s10, 0 }
  0x8d   :  { %126 = shalt.err (%p214_p10)  }
  0x8e   :  { %128 = vsyncmov [#allocation2 + $0x8] }
  0x91   :  { %s129_s11 = vpop.sfrf %128 }
  0x92   :  { %p215_p11 = scmp.ne.s32.totalorder %s129_s11, 0 }
  0x94   :  { %133 = shalt.err (%p215_p11)  }
  0x95   :  { %135 = vsyncmov [#allocation2 + $0x9] }
  0x98   :  { %s136_s12 = vpop.sfrf %135 }
  0x99   :  { %p216_p12 = scmp.ne.s32.totalorder %s136_s12, 0 }
  0x9b   :  { %140 = shalt.err (%p216_p12)  }
  0x9c   :  { %142 = vsyncmov [#allocation2 + $0xa] }
  0x9f   :  { %s143_s13 = vpop.sfrf %142 }
  0xa0   :  { %p217_p13 = scmp.ne.s32.totalorder %s143_s13, 0 }
  0xa2   :  { %147 = shalt.err (%p217_p13)  }
  0xa3   :  { %149 = vsyncmov [#allocation2 + $0xb] }
  0xa6   :  { %s150_s14 = vpop.sfrf %149 }
  0xa7   :  { %p218_p0 = scmp.ne.s32.totalorder %s150_s14, 0 }
  0xa9   :  { %154 = shalt.err (%p218_p0)  }
  0xaa   :  { %156 = vsyncmov [#allocation2 + $0xc] }
  0xad   :  { %s157_s15 = vpop.sfrf %156 }
  0xae   :  { %p219_p1 = scmp.ne.s32.totalorder %s157_s15, 0 }
  0xb0   :  { %161 = shalt.err (%p219_p1)  }
  0xb1   :  { %163 = vsyncmov [#allocation2 + $0xd] }
  0xb4   :  { %s164_s16 = vpop.sfrf %163 }
  0xb5   :  { %p220_p2 = scmp.ne.s32.totalorder %s164_s16, 0 }
  0xb7   :  { %168 = shalt.err (%p220_p2)  }
  0xb8   :  { %170 = vsyncmov [#allocation2 + $0xe] }
  0xbb   :  { %s171_s17 = vpop.sfrf %170 }
  0xbc   :  { %p221_p4 = scmp.ne.s32.totalorder %s171_s17, 0 }
  0xbe   :  { %175 = shalt.err (%p221_p4)  }
  0xbf   :  { %177 = vsyncmov [#allocation2 + $0xf] }
  0xc2   :  { %s178_s18 = vpop.sfrf %177 }
  0xc3   :  { %p222_p5 = scmp.ne.s32.totalorder %s178_s18, 0 }
  0xc5   :  { %182 = shalt.err (%p222_p5)  }

</bundles_post_ra>
